<compile_context>
chip_gen: v7x
topology: tpu7x:2x2x1
jax: 0.10.0
libtpu: 0.0.40
codegen_flags: <defaults>
</compile_context>

<pallas_src>
import functools
import math

import jax
import jax.numpy as jnp
from jax import lax
from jax.experimental import pallas as pl
from jax.experimental.pallas import tpu as pltpu


def _fnn_kernel(s_ref,            # SMEM: (1,)              scale = n * a1
                x_ref,            # VMEM: (tn, D_in)        f32 (batch-major, cast in-kernel)
                w1_ref,           # VMEM: (H, D_in)          bf16
                w2_ref,           # VMEM: (H, H)             bf16
                w3_ref,           # VMEM: (H, H)             bf16
                w4_ref,           # VMEM: (D_out, H)         bf16
                b_ref,            # VMEM: (max(H,D_out), 4)  f32 packed bias columns
                o_ref):           # VMEM: (D_out, tn)        f32 lane-dense output slab
    s = s_ref[0]
    h = w1_ref.shape[0]
    d_out = o_ref.shape[0]

    b = b_ref[...]                      # (max(H, D_out), 4) f32
    b1 = b[:h, 0:1]                     # (H, 1) — broadcast over lanes (batch)
    b2 = b[:h, 1:2]
    b3 = b[:h, 2:3]
    b4 = b[:d_out, 3:4]                 # (D_out, 1)

    # x arrives batch-major straight from HBM (no host transpose); bf16 cast here.
    x = x_ref[...].astype(jnp.bfloat16)                      # (tn, D_in)

    # Layer 1: contract the shared last (D_in) dim of W1 [H, D_in] and x [tn, D_in]
    # -> z1 [H, tn].  All activations stay lane-dense: [features, batch-on-lanes].
    z1 = lax.dot_general(w1_ref[...], x,
                         dimension_numbers=(((1,), (1,)), ((), ())),
                         preferred_element_type=jnp.float32)
    # NOTE: tanh kept in f32 so numerics/semantics are identical on v5e (no bf16
    # EUP/VPU); on v6e/v7x a bf16 tanh (~2x EUP rate) is a valid follow-up.
    y1 = jnp.tanh(s * (z1 + b1)).astype(jnp.bfloat16)

    z2 = jnp.dot(w2_ref[...], y1, preferred_element_type=jnp.float32)
    y2 = jnp.tanh(s * (z2 + b2)).astype(jnp.bfloat16)

    z3 = jnp.dot(w3_ref[...], y2, preferred_element_type=jnp.float32)
    y3 = jnp.tanh(s * (z3 + b3)).astype(jnp.bfloat16)

    # Layer 4: linear only.
    z4 = jnp.dot(w4_ref[...], y3, preferred_element_type=jnp.float32)
    o_ref[...] = (s * (z4 + b4)).astype(o_ref.dtype)


def _round_up(x, m):
    return ((x + m - 1) // m) * m


def _pick_lane_tile(n_pad):
    """Lane tile sized by vreg budget, not VMEM.

    Live per-layer intermediates are ~(32, tn) f32 + (32, tn) bf16 ≈ 192 B per
    lane column, so tn <= 512 keeps them resident in the 256 KiB vreg file on
    v5e/v6e/v7x.  For small batches use a single grid step: v5e/v6e have one
    TensorCore (splitting only adds ~0.35 us/step and re-walks the replicated
    weight windows), and on v7x the 2-TC split only pays off once per-core work
    exceeds the fixed per-step overhead (n_pad >= ~1024).
    """
    if n_pad <= 512:
        return n_pad
    tn = 512
    while n_pad % tn:
        tn -= 128          # n_pad is a multiple of 128, so this terminates
    return tn


def prepare_fnn_params(params):
    """One-time parameter prep (call once, reuse across forward calls).

    bf16 weight casts for the MXU and the four bias vectors packed into one
    (max(H, D_out), 4) f32 column matrix (fewer pallas_call operands / DMAs).
    """
    H = params["w1"].shape[0]
    D_out = params["w4"].shape[0]
    rows = max(H, D_out)                 # robust even if D_out > H
    b_cols = jnp.zeros((rows, 4), jnp.float32)
    b_cols = b_cols.at[:H, 0].set(params["b1"])
    b_cols = b_cols.at[:H, 1].set(params["b2"])
    b_cols = b_cols.at[:H, 2].set(params["b3"])
    b_cols = b_cols.at[:D_out, 3].set(params["b4"])
    return {
        "w1": params["w1"].astype(jnp.bfloat16),
        "w2": params["w2"].astype(jnp.bfloat16),
        "w3": params["w3"].astype(jnp.bfloat16),
        "w4": params["w4"].astype(jnp.bfloat16),
        "b_cols": b_cols,
    }


@functools.partial(jax.jit, static_argnames=("tn",))
def fnn_forward_t(x, prepared, scale, *, tn=None):
    """Forward pass.  x: [N, D_in] f32 -> [D_out, N] f32 (batch on lanes).

    This is the kernel's native output layout; fold the final transpose into the
    consumer, or use `fnn_forward` for the drop-in [N, D_out] view.
    """
    N, D_in = x.shape
    H = prepared["w1"].shape[0]
    D_out = prepared["w4"].shape[0]
    rows = prepared["b_cols"].shape[0]

    n_pad = _round_up(N, 128)
    if tn is None:
        tn = _pick_lane_tile(n_pad)
    n_pad = _round_up(n_pad, tn)
    grid = (n_pad // tn,)

    if n_pad != N:
        # Only materialized when N is not a multiple of the lane tile.
        x = jnp.pad(x, ((0, n_pad - N), (0, 0)))

    lane_tile = lambda i: (i, 0)         # tile x along its batch (sublane) axis
    out_tile = lambda i: (0, i)          # tile output along its lane (batch) axis
    replicated = lambda i: (0, 0)

    in_specs = [
        pl.BlockSpec(memory_space=pltpu.SMEM),            # scale (scalar)
        pl.BlockSpec((tn, D_in), lane_tile),               # x, batch-major f32
        pl.BlockSpec((H, D_in), replicated),               # w1
        pl.BlockSpec((H, H), replicated),                  # w2
        pl.BlockSpec((H, H), replicated),                  # w3
        pl.BlockSpec((D_out, H), replicated),              # w4
        pl.BlockSpec((rows, 4), replicated),               # packed biases
    ]
    out_spec = pl.BlockSpec((D_out, tn), out_tile)

    out_t = pl.pallas_call(
        _fnn_kernel,
        out_shape=jax.ShapeDtypeStruct((D_out, n_pad), jnp.float32),
        grid_spec=pltpu.PrefetchScalarGridSpec(
            num_scalar_prefetch=0,
            grid=grid,
            in_specs=in_specs,
            out_specs=out_spec,
        ),
        compiler_params=pltpu.CompilerParams(
            dimension_semantics=("parallel",)),
    )(scale, x, prepared["w1"], prepared["w2"], prepared["w3"],
      prepared["w4"], prepared["b_cols"])

    return out_t[:, :N] if n_pad != N else out_t


def fnn_forward(x, prepared, scale, *, tn=None):
    """Drop-in [N, D_in] -> [N, D_out] variant (adds one output transpose)."""
    return jnp.transpose(fnn_forward_t(x, prepared, scale, tn=tn))


def init_params(key, D_in, H, D_out):
    """Matches the PyTorch module's init: weights ~ N(0, sqrt(2/(fan_in+fan_out))),
    biases ~ N(0, 1).  Weights kept in PyTorch layout [out_features, in_features].
    """
    ks = jax.random.split(key, 8)
    return {
        "w1": (jax.random.normal(ks[0], (H, D_in)) * math.sqrt(2.0 / (D_in + H))
               ).astype(jnp.float32),
        "b1": jax.random.normal(ks[1], (H,)).astype(jnp.float32),
        "w2": (jax.random.normal(ks[2], (H, H)) * math.sqrt(2.0 / (H + H))
               ).astype(jnp.float32),
        "b2": jax.random.normal(ks[3], (H,)).astype(jnp.float32),
        "w3": (jax.random.normal(ks[4], (H, H)) * math.sqrt(2.0 / (H + H))
               ).astype(jnp.float32),
        "b3": jax.random.normal(ks[5], (H,)).astype(jnp.float32),
        "w4": (jax.random.normal(ks[6], (D_out, H)) * math.sqrt(2.0 / (H + D_out))
               ).astype(jnp.float32),
        "b4": jax.random.normal(ks[7], (D_out,)).astype(jnp.float32),
    }


def fnn_reference_f32(x, params, scale):
    s = scale[0]
    y1 = jnp.tanh(s * (x @ params["w1"].T + params["b1"]))
    y2 = jnp.tanh(s * (y1 @ params["w2"].T + params["b2"]))
    y3 = jnp.tanh(s * (y2 @ params["w3"].T + params["b3"]))
    return s * (y3 @ params["w4"].T + params["b4"])


def fnn_reference_bf16(x, params, scale):
    """Mirrors the kernel's precision: bf16 matmul operands, f32 accumulation."""
    s = scale[0]
    bf = lambda a: a.astype(jnp.bfloat16)
    z1 = jnp.dot(bf(x), bf(params["w1"]).T, preferred_element_type=jnp.float32)
    y1 = bf(jnp.tanh(s * (z1 + params["b1"])))
    z2 = jnp.dot(y1, bf(params["w2"]).T, preferred_element_type=jnp.float32)
    y2 = bf(jnp.tanh(s * (z2 + params["b2"])))
    z3 = jnp.dot(y2, bf(params["w3"]).T, preferred_element_type=jnp.float32)
    y3 = bf(jnp.tanh(s * (z3 + params["b3"])))
    z4 = jnp.dot(y3, bf(params["w4"]).T, preferred_element_type=jnp.float32)
    return s * (z4 + params["b4"])


if __name__ == "__main__":
    # Shapes implied by the LAME minimum-potential-energy use case:
    # small coordinate input, hidden width H, small displacement output.
    D_in, H, D_out = 3, 32, 2
    N = 256                      # batch of collocation points

    key = jax.random.PRNGKey(0)
    kx, kp = jax.random.split(key)
    x = jax.random.normal(kx, (N, D_in), dtype=jnp.float32)
    params = init_params(kp, D_in, H, D_out)
    prepared = prepare_fnn_params(params)    # one-time prep, reused across calls

    # n = 1 / a1.data is frozen at __init__ (a1 = 0.1), so at init the forward
    # scale is s = n * a1 == 1.0.  Kept explicit as a runtime (1,) array.
    n = 1.0 / 0.1
    scale = jnp.asarray([n * 0.1], dtype=jnp.float32)

    out_t = fnn_forward_t(x, prepared, scale)      # (D_out, N) native lane-dense layout
    out_t = jax.block_until_ready(out_t)
    assert out_t.shape == (D_out, N)

    # Tight check against a reference with the same (bf16-in / f32-acc) precision,
    # loose check against the pure-f32 math to confirm semantics.  The transpose
    # is folded into the comparison (consumer side), not the kernel wrapper.
    ref_bf16 = fnn_reference_bf16(x, params, scale)
    ref_f32 = fnn_reference_f32(x, params, scale)
    assert jnp.allclose(out_t, ref_bf16.T, atol=1e-3, rtol=1e-3), \
        "mismatch vs precision-matched reference"
    assert jnp.allclose(out_t, ref_f32.T, atol=5e-2, rtol=5e-2), \
        "mismatch vs f32 reference"

    # Exercise a non-trivial scale (a1 is trainable, n stays frozen): s = 1.3.
    scale2 = jnp.asarray([n * 0.13], dtype=jnp.float32)
    out_t2 = jax.block_until_ready(fnn_forward_t(x, prepared, scale2))
    ref2 = fnn_reference_bf16(x, params, scale2)
    assert jnp.allclose(out_t2, ref2.T, atol=1e-2, rtol=1e-2), \
        "mismatch with non-unit scale"

    # Drop-in [N, D_out] wrapper agrees with the native-layout output.
    out = jax.block_until_ready(fnn_forward(x, prepared, scale))
    assert out.shape == (N, D_out)
    assert jnp.allclose(out, out_t.T)

    print("KERNEL_OK")
</pallas_src>

<mosaic_0001>
module attributes {stable_mosaic.version = 11 : i64} {
  func.func @_fnn_kernel(%arg0: i32, %arg1: memref<1xf32, #tpu.memory_space<smem>>, %arg2: memref<256x3xf32, #tpu.memory_space<vmem>>, %arg3: memref<32x3xbf16, #tpu.memory_space<vmem>>, %arg4: memref<32x32xbf16, #tpu.memory_space<vmem>>, %arg5: memref<32x32xbf16, #tpu.memory_space<vmem>>, %arg6: memref<2x32xbf16, #tpu.memory_space<vmem>>, %arg7: memref<32x4xf32, #tpu.memory_space<vmem>>, %arg8: memref<2x256xf32, #tpu.memory_space<vmem>>) attributes {dimension_semantics = [#tpu.dimension_semantics<parallel>], iteration_bounds = array<i64: 1>, scalar_prefetch = 0 : i64, scratch_operands = 0 : i64, tpu.core_type = #tpu.core_type<tc>, window_params = [{transform_indices = @transform_0, window_bounds = array<i64: 1>}, {transform_indices = @transform_1, window_bounds = array<i64: 256, 3>}, {pipeline_mode = #tpu.pipeline_mode<synchronous>, transform_indices = @transform_2, window_bounds = array<i64: 32, 3>}, {pipeline_mode = #tpu.pipeline_mode<synchronous>, transform_indices = @transform_3, window_bounds = array<i64: 32, 32>}, {pipeline_mode = #tpu.pipeline_mode<synchronous>, transform_indices = @transform_4, window_bounds = array<i64: 32, 32>}, {pipeline_mode = #tpu.pipeline_mode<synchronous>, transform_indices = @transform_5, window_bounds = array<i64: 2, 32>}, {pipeline_mode = #tpu.pipeline_mode<synchronous>, transform_indices = @transform_6, window_bounds = array<i64: 32, 4>}, {transform_indices = @transform_7, window_bounds = array<i64: 2, 256>}]} {
    %c0 = arith.constant 0 : index
    %0 = memref.load %arg1[%c0] : memref<1xf32, #tpu.memory_space<smem>>
    %c0_0 = arith.constant 0 : index
    %c0_1 = arith.constant 0 : index
    %1 = vector.load %arg7[%c0_0, %c0_1] : memref<32x4xf32, #tpu.memory_space<vmem>>, vector<32x4xf32>
    %2 = vector.extract_strided_slice %1 {offsets = [0, 0], sizes = [32, 1], strides = [1, 1]} : vector<32x4xf32> to vector<32x1xf32>
    %3 = vector.extract_strided_slice %1 {offsets = [0, 1], sizes = [32, 1], strides = [1, 1]} : vector<32x4xf32> to vector<32x1xf32>
    %4 = vector.extract_strided_slice %1 {offsets = [0, 2], sizes = [32, 1], strides = [1, 1]} : vector<32x4xf32> to vector<32x1xf32>
    %5 = vector.extract_strided_slice %1 {offsets = [0, 3], sizes = [2, 1], strides = [1, 1]} : vector<32x4xf32> to vector<2x1xf32>
    %c0_2 = arith.constant 0 : index
    %c0_3 = arith.constant 0 : index
    %6 = vector.load %arg2[%c0_2, %c0_3] : memref<256x3xf32, #tpu.memory_space<vmem>>, vector<256x3xf32>
    %7 = arith.truncf %6 : vector<256x3xf32> to vector<256x3xbf16>
    %c0_4 = arith.constant 0 : index
    %c0_5 = arith.constant 0 : index
    %8 = vector.load %arg3[%c0_4, %c0_5] : memref<32x3xbf16, #tpu.memory_space<vmem>>, vector<32x3xbf16>
    %cst = arith.constant dense<0.000000e+00> : vector<32x256xf32>
    %9 = tpu.matmul %8, %7, %cst {dimension_numbers = #tpu.dot_dimension_numbers<[1], [1], [0], [0], [0, 0, 1, 0], [], []>} : vector<32x3xbf16>, vector<256x3xbf16>, vector<32x256xf32> -> vector<32x256xf32>
    %10 = vector.broadcast %2 : vector<32x1xf32> to vector<32x256xf32>
    %11 = arith.addf %9, %10 : vector<32x256xf32>
    %12 = vector.broadcast %0 : f32 to vector<32x256xf32>
    %13 = arith.mulf %12, %11 : vector<32x256xf32>
    %14 = math.tanh %13 : vector<32x256xf32>
    %15 = arith.truncf %14 : vector<32x256xf32> to vector<32x256xbf16>
    %c0_6 = arith.constant 0 : index
    %c0_7 = arith.constant 0 : index
    %16 = vector.load %arg4[%c0_6, %c0_7] : memref<32x32xbf16, #tpu.memory_space<vmem>>, vector<32x32xbf16>
    %cst_8 = arith.constant dense<0.000000e+00> : vector<32x256xf32>
    %17 = tpu.matmul %16, %15, %cst_8 {dimension_numbers = #tpu.dot_dimension_numbers<[1], [0], [0], [1], [0, 0, 1, 1], [], []>} : vector<32x32xbf16>, vector<32x256xbf16>, vector<32x256xf32> -> vector<32x256xf32>
    %18 = vector.broadcast %3 : vector<32x1xf32> to vector<32x256xf32>
    %19 = arith.addf %17, %18 : vector<32x256xf32>
    %20 = vector.broadcast %0 : f32 to vector<32x256xf32>
    %21 = arith.mulf %20, %19 : vector<32x256xf32>
    %22 = math.tanh %21 : vector<32x256xf32>
    %23 = arith.truncf %22 : vector<32x256xf32> to vector<32x256xbf16>
    %c0_9 = arith.constant 0 : index
    %c0_10 = arith.constant 0 : index
    %24 = vector.load %arg5[%c0_9, %c0_10] : memref<32x32xbf16, #tpu.memory_space<vmem>>, vector<32x32xbf16>
    %cst_11 = arith.constant dense<0.000000e+00> : vector<32x256xf32>
    %25 = tpu.matmul %24, %23, %cst_11 {dimension_numbers = #tpu.dot_dimension_numbers<[1], [0], [0], [1], [0, 0, 1, 1], [], []>} : vector<32x32xbf16>, vector<32x256xbf16>, vector<32x256xf32> -> vector<32x256xf32>
    %26 = vector.broadcast %4 : vector<32x1xf32> to vector<32x256xf32>
    %27 = arith.addf %25, %26 : vector<32x256xf32>
    %28 = vector.broadcast %0 : f32 to vector<32x256xf32>
    %29 = arith.mulf %28, %27 : vector<32x256xf32>
    %30 = math.tanh %29 : vector<32x256xf32>
    %31 = arith.truncf %30 : vector<32x256xf32> to vector<32x256xbf16>
    %c0_12 = arith.constant 0 : index
    %c0_13 = arith.constant 0 : index
    %32 = vector.load %arg6[%c0_12, %c0_13] : memref<2x32xbf16, #tpu.memory_space<vmem>>, vector<2x32xbf16>
    %cst_14 = arith.constant dense<0.000000e+00> : vector<2x256xf32>
    %33 = tpu.matmul %32, %31, %cst_14 {dimension_numbers = #tpu.dot_dimension_numbers<[1], [0], [0], [1], [0, 0, 1, 1], [], []>} : vector<2x32xbf16>, vector<32x256xbf16>, vector<2x256xf32> -> vector<2x256xf32>
    %34 = vector.broadcast %5 : vector<2x1xf32> to vector<2x256xf32>
    %35 = arith.addf %33, %34 : vector<2x256xf32>
    %36 = vector.broadcast %0 : f32 to vector<2x256xf32>
    %37 = arith.mulf %36, %35 : vector<2x256xf32>
    %c0_15 = arith.constant 0 : index
    %c0_16 = arith.constant 0 : index
    %38 = vector.load %arg8[%c0_15, %c0_16] : memref<2x256xf32, #tpu.memory_space<vmem>>, vector<2x256xf32>
    tpu.vector_store %arg8[%c0_15, %c0_16], %37 {strides = array<i32>} : memref<2x256xf32, #tpu.memory_space<vmem>>, vector<2x256xf32>,
    return
  }
  func.func @transform_0(%arg0: i32) -> i32 {
    %c0_i32 = arith.constant 0 : i32
    %c0_i32_0 = arith.constant 0 : i32
    return %c0_i32 : i32
  }
  func.func @transform_1(%arg0: i32) -> (i32, i32) {
    %c0_i32 = arith.constant 0 : i32
    %c0_i32_0 = arith.constant 0 : i32
    return %arg0, %c0_i32 : i32, i32
  }
  func.func @transform_2(%arg0: i32) -> (i32, i32) {
    %c0_i32 = arith.constant 0 : i32
    %c0_i32_0 = arith.constant 0 : i32
    %c0_i32_1 = arith.constant 0 : i32
    return %c0_i32, %c0_i32_0 : i32, i32
  }
  func.func @transform_3(%arg0: i32) -> (i32, i32) {
    %c0_i32 = arith.constant 0 : i32
    %c0_i32_0 = arith.constant 0 : i32
    %c0_i32_1 = arith.constant 0 : i32
    return %c0_i32, %c0_i32_0 : i32, i32
  }
  func.func @transform_4(%arg0: i32) -> (i32, i32) {
    %c0_i32 = arith.constant 0 : i32
    %c0_i32_0 = arith.constant 0 : i32
    %c0_i32_1 = arith.constant 0 : i32
    return %c0_i32, %c0_i32_0 : i32, i32
  }
  func.func @transform_5(%arg0: i32) -> (i32, i32) {
    %c0_i32 = arith.constant 0 : i32
    %c0_i32_0 = arith.constant 0 : i32
    %c0_i32_1 = arith.constant 0 : i32
    return %c0_i32, %c0_i32_0 : i32, i32
  }
  func.func @transform_6(%arg0: i32) -> (i32, i32) {
    %c0_i32 = arith.constant 0 : i32
    %c0_i32_0 = arith.constant 0 : i32
    %c0_i32_1 = arith.constant 0 : i32
    return %c0_i32, %c0_i32_0 : i32, i32
  }
  func.func @transform_7(%arg0: i32) -> (i32, i32) {
    %c0_i32 = arith.constant 0 : i32
    %c0_i32_0 = arith.constant 0 : i32
    return %c0_i32, %arg0 : i32, i32
  }
}

</mosaic_0001>

<bundles_post_ra>
// kernel: fnn_forward_t.1
= control target key start
LH: loop header
LB: loop body
LE: loop exit
PB: predicated region body
PF: predicated region fallthrough
CT: control target
= control target key end

     0   :  { %vm116_vm0 = vcmask 23552   ;;  %v673_v7 = vmov 0   ;;  %s943_s0 = inlined_call_operand.<no memory space> [shape: f32[1], index: 0, kind: input, shape index: {}]   ;;  %s944_s1 = inlined_call_operand.vmem [shape: f32[256,3], index: 1, kind: input, shape index: {}]   ;;  %s945_s2 = inlined_call_operand.vmem [shape: bf16[32,3], index: 2, kind: input, shape index: {}]   ;;  %s946_s3 = inlined_call_operand.vmem [shape: bf16[32,32], index: 3, kind: input, shape index: {}]   ;;  %s947_s4 = inlined_call_operand.vmem [shape: bf16[32,32], index: 4, kind: input, shape index: {}]   ;;  %s948_s5 = inlined_call_operand.vmem [shape: bf16[2,32], index: 5, kind: input, shape index: {}]   ;;  %s949_s6 = inlined_call_operand.vmem [shape: f32[32,4], index: 6, kind: input, shape index: {}]   ;;  %s950_s7 = inlined_call_operand.hbm [shape: f32[2,256], index: 7, kind: output, shape index: {}]  }
   0x1   :  { %v50_v0 = vld [vmem:[%s944_s1 + $0x80] sm:$0xff]  ;;  %v51_v1 = vld [vmem:[%s944_s1 + $0x88] sm:$0xff]  ;;  %v52_v5 = vld [vmem:[%s944_s1 + $0x90] sm:$0xff]  ;;  %588 = vset.pattern.permute.xlu0 %v673_v7  ;;  %589 = vset.pattern.permute.xlu1 %v673_v7 }
   0x2   :  { %v34_v2 = vld [vmem:[%s944_s1] sm:$0xff]  ;;  %v74_v3 = vpack.c.bf16 %v51_v1, %v50_v0  ;;  %v35_v4 = vld [vmem:[%s944_s1 + $0x8] sm:$0xff]  ;;  %v53_v6 = vld [vmem:[%s944_s1 + $0x98] sm:$0xff]  ;;  %314 = vmatprep.mubr.bf16.mxu1 %v673_v7 }
   0x3   :  { %v66_v8 = vpack.c.bf16 %v35_v4, %v34_v2  ;;  %v75_v9 = vpack.c.bf16 %v53_v6, %v52_v5  ;;  %v36_v10 = vld [vmem:[%s944_s1 + $0x10] sm:$0xff]  ;;  %v37_v11 = vld [vmem:[%s944_s1 + $0x18] sm:$0xff]  ;;  %v54_v14 = vld [vmem:[%s944_s1 + $0xa0] sm:$0xff] }
   0x4   :  { %575 = vmatprep.subr.msk.bf16.mxu0 %vm116_vm0, %v74_v3  ;;  %v67_v13 = vpack.c.bf16 %v37_v11, %v36_v10  ;;  %v55_v15 = vld [vmem:[%s944_s1 + $0xa8] sm:$0xff]  ;;  %v38_v18 = vld [vmem:[%s944_s1 + $0x20] sm:$0xff]  ;;  %v56_v22 = vld [vmem:[%s944_s1 + $0xb0] sm:$0xff] }
   0x5   :  { %v124_v12 = vsel %vm116_vm0, %v66_v8, 0  ;;  %v76_v17 = vpack.c.bf16 %v55_v15, %v54_v14  ;;  %v39_v19 = vld [vmem:[%s944_s1 + $0x28] sm:$0xff]  ;;  %v595_v20 = vld [vmem:[%s945_s2] sm:$0xff]   ;;  %v57_v23 = vld [vmem:[%s944_s1 + $0xb8] sm:$0xff] }
   0x6   :  { %556 = vmatpush3.bf16.xpose.msra.mxu0 %v124_v12  ;;  %v127_v16 = vsel %vm116_vm0, %v67_v13, 0  ;;  %v767_v21 = vld [vmem:[%s949_s6] sm:$0xff]  ;;  %571 = vmatprep.mubr.msk.bf16.mxu0 %vm116_vm0, %v595_v20  ;;  %v779_v24 = vld [vmem:[%s949_s6 + $0x8] sm:$0xff]  ;;  %v784_v25 = vld [vmem:[%s949_s6 + $0x10] sm:$0xff]  ;;  %v68_v26 = vpack.c.bf16 %v39_v19, %v38_v18 }
   0x7   :  { %576 = vmatprep.subr.msk.bf16.mxu0 %vm116_vm0, %v75_v9  ;;  %88 = vperm.xlu0 %588, %v767_v21   ;;  %v791_v27 = vld [vmem:[%s949_s6 + $0x18] sm:$0xff] }
   0x8   :  { %98 = vperm.xlu1 %589, %v784_v25  }
   0xe   :  { %558 = vmatpush3.bf16.xpose.msra.mxu0 %v127_v16 }
   0xf   :  { %577 = vmatprep.subr.msk.bf16.mxu0 %vm116_vm0, %v76_v17 }
  0x10   :  { %13 = vsyncpa [#allocation4], 0  ;;  %v130_v28 = vsel %vm116_vm0, %v68_v26, 0  ;;  %v77_v29 = vpack.c.bf16 %v57_v23, %v56_v22  ;;  %93 = vperm.xlu0 %588, %v779_v24   ;;  %v40_v30 = vld [vmem:[%s944_s1 + $0x30] sm:$0xff]  ;;  %v41_v31 = vld [vmem:[%s944_s1 + $0x38] sm:$0xff]  ;;  %103 = vperm.xlu1 %589, %v791_v27   ;;  %v674_v63 = vmov 1   ;;  %v874_v2 = vstv %s943_s0 }
  0x11   :  { %v69_v32 = vpack.c.bf16 %v41_v31, %v40_v30  ;;  %v58_v33 = vld [vmem:[%s944_s1 + $0xc0] sm:$0xff]  ;;  %v59_v34 = vld [vmem:[%s944_s1 + $0xc8] sm:$0xff]  ;;  %v60_v40 = vld [vmem:[%s944_s1 + $0xd0] sm:$0xff]  ;;  %vm275_vm1 = vcmask 261120   ;;  %s677_s13 = smov [#allocation3]  }
  0x12   :  { %v78_v36 = vpack.c.bf16 %v59_v34, %v58_v33  ;;  %v42_v37 = vld [vmem:[%s944_s1 + $0x40] sm:$0xff]  ;;  %v43_v38 = vld [vmem:[%s944_s1 + $0x48] sm:$0xff]  ;;  %v61_v41 = vld [vmem:[%s944_s1 + $0xd8] sm:$0xff]  ;;  %s533_s14 = sshll.u32 %s677_s13, 4  ;;  %s534_s14 = int_to_ptr.vmem [resolvable:$true] %s533_s14 }
  0x13   :  { %v133_v35 = vsel %vm116_vm0, %v69_v32, 0  ;;  %v70_v39 = vpack.c.bf16 %v43_v38, %v42_v37  ;;  %v79_v43 = vpack.c.bf16 %v61_v41, %v60_v40  ;;  %v44_v44 = vld [vmem:[%s944_s1 + $0x50] sm:$0xff]  ;;  %v45_v45 = vld [vmem:[%s944_s1 + $0x58] sm:$0xff]  ;;  %v62_v47 = vld [vmem:[%s944_s1 + $0xe0] sm:$0xff]  ;;  %s649_s15 = scalar_lea.vmem %s534_s14, 64  ;;  %p654_p1 = scmp.lt.s32.totalorder %s534_s14, %s534_s14 }
  0x14   :  { %v71_v46 = vpack.c.bf16 %v45_v45, %v44_v44  ;;  %v63_v48 = vld [vmem:[%s944_s1 + $0xe8] sm:$0xff]  ;;  %v46_v51 = vld [vmem:[%s944_s1 + $0x60] sm:$0xff]  ;;  %v64_v54 = vld [vmem:[%s944_s1 + $0xf0] sm:$0xff]  ;;  %591 = vset.pattern.permute.xlu1 %v674_v63  ;;  %590 = vset.pattern.permute.xlu0 %v674_v63  ;;  %p650_p0 = scmp.ne.s32.totalorder %s534_s14, %s649_s15  ;;  %p655_p2 = scmp.lt.s32.totalorder %s649_s15, %s649_s15 }
  0x15   :  { %v136_v42 = vsel %vm116_vm0, %v70_v39, 0  ;;  %v80_v50 = vpack.c.bf16 %v63_v48, %v62_v47  ;;  %v47_v52 = vld [vmem:[%s944_s1 + $0x68] sm:$0xff]  ;;  %v65_v55 = vld [vmem:[%s944_s1 + $0xf8] sm:$0xff]  ;;  %v48_v58 = vld [vmem:[%s944_s1 + $0x70] sm:$0xff]  ;;  %254 = vperm.xlu1 %591, %v779_v24   ;;  %250 = vperm.xlu0 %590, %v767_v21   ;;  %v675_v48 = vmov 2  }
  0x16   :  { %560 = vmatpush3.bf16.xpose.msra.mxu0 %v130_v28  ;;  %v139_v49 = vsel %vm116_vm0, %v71_v46, 0  ;;  %v72_v53 = vpack.c.bf16 %v47_v52, %v46_v51  ;;  %v81_v57 = vpack.c.bf16 %v65_v55, %v64_v54  ;;  %v49_v59 = vld [vmem:[%s944_s1 + $0x78] sm:$0xff]  ;;  %v596_v62 = vld [vmem:[%s945_s2 + $0x8] sm:$0xff]   ;;  %v597_v46 = vld [vmem:[%s946_s3] sm:$0xff]   ;;  %p656_p3 = por %p655_p2, %p654_p1 }
  0x17   :  { %578 = vmatprep.subr.msk.bf16.mxu0 %vm116_vm0, %v77_v29  ;;  %v73_v60 = vpack.c.bf16 %v49_v59, %v48_v58  ;;  %v598_v47 = vld [vmem:[%s946_s3 + $0x8] sm:$0xff]  }
  0x18   :  { %v142_v56 = vsel %vm116_vm0, %v72_v53, 0  ;;  %p657_p4 = pnand %p656_p3, %p650_p0 }
  0x19   :  { %v145_v61 = vsel %vm116_vm0, %v73_v60, 0  ;;  %258 = vperm.xlu1 %591, %v784_v25   ;;  %262 = vperm.xlu0 %590, %v791_v27  }
  0x1d   :  { %592 = vset.pattern.permute.xlu1 %v675_v48  ;;  %593 = vset.pattern.permute.xlu0 %v675_v48 }
  0x1e   :  { %562 = vmatpush3.bf16.xpose.msra.mxu0 %v133_v35  ;;  %360 = vperm.xlu1 %592, %v767_v21  }
  0x1f   :  { %579 = vmatprep.subr.msk.bf16.mxu0 %vm116_vm0, %v78_v36  ;;  %364 = vperm.xlu0 %593, %v779_v24  }
  0x22   :  { %368 = vperm.xlu1 %592, %v784_v25  }
  0x26   :  { %564 = vmatpush3.bf16.xpose.msra.mxu0 %v136_v42  ;;  %372 = vperm.xlu1 %592, %v791_v27  }
  0x27   :  { %580 = vmatprep.subr.msk.bf16.mxu0 %vm116_vm0, %v79_v43 }
  0x2e   :  { %566 = vmatpush3.bf16.xpose.msra.mxu0 %v139_v49 }
  0x2f   :  { %581 = vmatprep.subr.msk.bf16.mxu0 %vm116_vm0, %v80_v50 }
  0x36   :  { %568 = vmatpush3.bf16.xpose.msra.mxu0 %v142_v56 }
  0x37   :  { %582 = vmatprep.subr.msk.bf16.mxu0 %vm116_vm0, %v81_v57 }
  0x3e   :  { %570 = vmatpush3.bf16.xpose.msra.mxu0 %v145_v61 }
  0x45   :  { %572 = vmatmul.mubr.msk.bf16.vlgmr.msra.gmra.mrb[0].mxu0 %vm116_vm0, %v595_v20 }
  0x46   :  { %573 = vmatprep.mubr.msk.bf16.mxu0 %vm116_vm0, %v596_v62 }
  0x4d   :  { %574 = vmatmul.mubr.msk.bf16.gmra.mrb[4].mxu0 %vm116_vm0, %v596_v62 }
  0x86   :  { %v89_v0 = vpop.permute.xlu0 %88 }
  0x87   :  { %v99_v14 = vpop.permute.xlu1 %98 }
  0x8f   :  { %v94_v3 = vpop.permute.xlu0 %93  ;;  %v104_v20 = vpop.permute.xlu1 %103 }
  0x94   :  { %v251_v49 = vpop.permute.xlu0 %250  ;;  %v255_v50 = vpop.permute.xlu1 %254 }
  0x98   :  { %v259_v25 = vpop.permute.xlu1 %258 }
 0x118   :  { %v205_v1 = vpop.f32.mrb[0].mxu0 }
 0x119   :  { %v206_v4 = vadd.f32 %v205_v1, %v89_v0  ;;  %v207_v5 = vpop.f32.mrb[1].mxu0 }
 0x11a   :  { %v208_v6 = vadd.f32 %v207_v5, %v89_v0  ;;  %v209_v8 = vpop.f32.mrb[2].mxu0  ;;  %v263_v0 = vpop.permute.xlu0 %262 }
 0x11b   :  { %v225_v9 = vmul.f32 %v874_v2, %v206_v4  ;;  %v210_v10 = vadd.f32 %v209_v8, %v94_v3  ;;  %v211_v11 = vpop.f32.mrb[3].mxu0 }
 0x11c   :  { %v226_v12 = vmul.f32 %v874_v2, %v208_v6  ;;  %v212_v13 = vadd.f32 %v211_v11, %v94_v3 }
 0x11d   :  { %601 = vtanh.f32 %v225_v9  ;;  %v227_v15 = vmul.f32 %v874_v2, %v210_v10 }
 0x11e   :  { %603 = vtanh.f32 %v226_v12  ;;  %v228_v16 = vmul.f32 %v874_v2, %v212_v13 }
 0x11f   :  { %605 = vtanh.f32 %v227_v15 }
 0x120   :  { %607 = vtanh.f32 %v228_v16  ;;  %v215_v17 = vpop.f32.mrb[4].mxu0 }
 0x121   :  { %v216_v18 = vadd.f32 %v215_v17, %v99_v14  ;;  %v217_v19 = vpop.f32.mrb[5].mxu0 }
 0x122   :  { %v218_v22 = vadd.f32 %v217_v19, %v99_v14  ;;  %v219_v23 = vpop.f32.mrb[6].mxu0 }
 0x123   :  { %v229_v26 = vmul.f32 %v874_v2, %v216_v18  ;;  %v220_v28 = vadd.f32 %v219_v23, %v104_v20  ;;  %v221_v29 = vpop.f32.mrb[7].mxu0 }
 0x124   :  { %v230_v30 = vmul.f32 %v874_v2, %v218_v22  ;;  %v222_v31 = vadd.f32 %v221_v29, %v104_v20  ;;  %v600_v29 = vld [vmem:[%s947_s4 + $0x8] sm:$0xff]  }
 0x125   :  { %609 = vtanh.f32 %v229_v26  ;;  %v231_v32 = vmul.f32 %v874_v2, %v220_v28  ;;  %v599_v28 = vld [vmem:[%s947_s4] sm:$0xff]  }
 0x126   :  { %611 = vtanh.f32 %v230_v30  ;;  %v232_v33 = vmul.f32 %v874_v2, %v222_v31  ;;  %v676_v30 = vmov 3   ;;  %v361_v31 = vpop.permute.xlu1 %360 }
 0x127   :  { %v602_v34 = vpop.eup %601  ;;  %613 = vtanh.f32 %v231_v32  ;;  %594 = vset.pattern.permute.xlu0 %v676_v30 }
 0x128   :  { %v604_v35 = vpop.eup %603  ;;  %615 = vtanh.f32 %v232_v33  ;;  %466 = vperm.xlu0 %594, %v767_v21   ;;  %v365_v33 = vpop.permute.xlu0 %364 }
 0x129   :  { %v606_v36 = vpop.eup %605 }
 0x12a   :  { %v608_v37 = vpop.eup %607  ;;  %v241_v38 = vpack.c.bf16 %v606_v36, %v602_v34 }
 0x12b   :  { %v242_v39 = vpack.c.bf16 %v608_v37, %v604_v35 }
 0x12d   :  { %282 = vmatprep.subr.bf16.mxu1 %v242_v39 }
 0x12e   :  { %283 = vmatpush1.bf16.msra.mxu1 %v241_v38 }
 0x12f   :  { %v610_v40 = vpop.eup %609 }
 0x130   :  { %v612_v41 = vpop.eup %611 }
 0x131   :  { %v614_v42 = vpop.eup %613 }
 0x132   :  { %v616_v43 = vpop.eup %615  ;;  %v243_v44 = vpack.c.bf16 %v614_v42, %v610_v40 }
 0x133   :  { %v244_v45 = vpack.c.bf16 %v616_v43, %v612_v41  ;;  %v369_v41 = vpop.permute.xlu1 %368 }
 0x135   :  { %284 = vmatprep.subr.bf16.mxu1 %v244_v45 }
 0x136   :  { %285 = vmatpush1.bf16.msra.mxu1 %v243_v44 }
 0x139   :  { %547 = vmatmul.mubr.msk.bf16.vlgmr.msra.gmra.mrb[0].mxu1 %vm275_vm1, %v597_v46 }
 0x13a   :  { %324 = vmatprep.mubr.bf16.mxu1 %v673_v7 }
 0x141   :  { %548 = vmatmul.mubr.msk.bf16.gmra.mrb[4].mxu1 %vm275_vm1, %v598_v47  ;;  %v373_v47 = vpop.permute.xlu1 %372 }
 0x142   :  { %423 = vmatprep.mubr.bf16.mxu1 %v673_v7 }
 0x20c   :  { %v316_v51 = vpop.f32.mrb[0].mxu1 }
 0x20d   :  { %v317_v52 = vadd.f32 %v316_v51, %v251_v49  ;;  %v318_v53 = vpop.f32.mrb[1].mxu1 }
 0x20e   :  { %v319_v54 = vadd.f32 %v318_v53, %v251_v49  ;;  %v320_v55 = vpop.f32.mrb[2].mxu1 }
 0x20f   :  { %v335_v56 = vmul.f32 %v317_v52, %v874_v2  ;;  %v321_v57 = vadd.f32 %v320_v55, %v255_v50  ;;  %v322_v58 = vpop.f32.mrb[3].mxu1 }
 0x210   :  { %v336_v59 = vmul.f32 %v319_v54, %v874_v2  ;;  %v323_v60 = vadd.f32 %v322_v58, %v255_v50 }
 0x211   :  { %617 = vtanh.f32 %v335_v56  ;;  %v337_v24 = vmul.f32 %v321_v57, %v874_v2 }
 0x212   :  { %619 = vtanh.f32 %v336_v59  ;;  %v338_v27 = vmul.f32 %v323_v60, %v874_v2 }
 0x213   :  { %621 = vtanh.f32 %v337_v24 }
 0x214   :  { %623 = vtanh.f32 %v338_v27  ;;  %v326_v61 = vpop.f32.mrb[4].mxu1 }
 0x215   :  { %v327_v62 = vadd.f32 %v326_v61, %v259_v25  ;;  %v328_v63 = vpop.f32.mrb[5].mxu1 }
 0x216   :  { %v329_v1 = vadd.f32 %v328_v63, %v259_v25  ;;  %v330_v3 = vpop.f32.mrb[6].mxu1 }
 0x217   :  { %v339_v4 = vmul.f32 %v327_v62, %v874_v2  ;;  %v331_v5 = vadd.f32 %v330_v3, %v263_v0  ;;  %v332_v6 = vpop.f32.mrb[7].mxu1  ;;  %v464_v3 = vld [vmem:[%s948_s5] sm:$0x1] }
 0x218   :  { %v340_v8 = vmul.f32 %v329_v1, %v874_v2  ;;  %v333_v9 = vadd.f32 %v332_v6, %v263_v0 }
 0x219   :  { %625 = vtanh.f32 %v339_v4  ;;  %v341_v10 = vmul.f32 %v331_v5, %v874_v2  ;;  %v467_v4 = vpop.permute.xlu0 %466 }
 0x21a   :  { %627 = vtanh.f32 %v340_v8  ;;  %v342_v11 = vmul.f32 %v333_v9, %v874_v2 }
 0x21b   :  { %v618_v12 = vpop.eup %617  ;;  %629 = vtanh.f32 %v341_v10 }
 0x21c   :  { %v620_v13 = vpop.eup %619  ;;  %631 = vtanh.f32 %v342_v11 }
 0x21d   :  { %v622_v14 = vpop.eup %621 }
 0x21e   :  { %v624_v15 = vpop.eup %623  ;;  %v351_v16 = vpack.c.bf16 %v622_v14, %v618_v12 }
 0x21f   :  { %v352_v17 = vpack.c.bf16 %v624_v15, %v620_v13 }
 0x221   :  { %391 = vmatprep.subr.bf16.mxu1 %v352_v17 }
 0x222   :  { %392 = vmatpush1.bf16.msra.mxu1 %v351_v16 }
 0x223   :  { %v626_v18 = vpop.eup %625 }
 0x224   :  { %v628_v19 = vpop.eup %627 }
 0x225   :  { %v630_v20 = vpop.eup %629 }
 0x226   :  { %v632_v22 = vpop.eup %631  ;;  %v353_v23 = vpack.c.bf16 %v630_v20, %v626_v18 }
 0x227   :  { %v354_v26 = vpack.c.bf16 %v632_v22, %v628_v19 }
 0x229   :  { %393 = vmatprep.subr.bf16.mxu1 %v354_v26 }
 0x22a   :  { %394 = vmatpush1.bf16.msra.mxu1 %v353_v23 }
 0x22d   :  { %551 = vmatmul.mubr.msk.bf16.vlgmr.msra.gmra.mrb[8].mxu1 %vm275_vm1, %v599_v28 }
 0x22e   :  { %433 = vmatprep.mubr.bf16.mxu1 %v673_v7 }
 0x235   :  { %552 = vmatmul.mubr.msk.bf16.gmra.mrb[12].mxu1 %vm275_vm1, %v600_v29 }
 0x236   :  { %504 = vmatprep.mubr.bf16.mxu1 %v673_v7 }
 0x300   :  { %v425_v32 = vpop.f32.mrb[8].mxu1 }
 0x301   :  { %v426_v34 = vadd.f32 %v425_v32, %v361_v31  ;;  %v427_v35 = vpop.f32.mrb[9].mxu1 }
 0x302   :  { %v428_v36 = vadd.f32 %v427_v35, %v361_v31  ;;  %v429_v37 = vpop.f32.mrb[10].mxu1 }
 0x303   :  { %v444_v38 = vmul.f32 %v426_v34, %v874_v2  ;;  %v430_v39 = vadd.f32 %v429_v37, %v365_v33  ;;  %v431_v40 = vpop.f32.mrb[11].mxu1 }
 0x304   :  { %v445_v42 = vmul.f32 %v428_v36, %v874_v2  ;;  %v432_v43 = vadd.f32 %v431_v40, %v365_v33 }
 0x305   :  { %633 = vtanh.f32 %v444_v38  ;;  %v446_v7 = vmul.f32 %v430_v39, %v874_v2 }
 0x306   :  { %635 = vtanh.f32 %v445_v42  ;;  %v447_v21 = vmul.f32 %v432_v43, %v874_v2 }
 0x307   :  { %637 = vtanh.f32 %v446_v7 }
 0x308   :  { %639 = vtanh.f32 %v447_v21  ;;  %v435_v44 = vpop.f32.mrb[12].mxu1 }
 0x309   :  { %v436_v45 = vadd.f32 %v435_v44, %v369_v41  ;;  %v437_v46 = vpop.f32.mrb[13].mxu1 }
 0x30a   :  { %v438_v48 = vadd.f32 %v437_v46, %v369_v41  ;;  %v439_v49 = vpop.f32.mrb[14].mxu1 }
 0x30b   :  { %v448_v50 = vmul.f32 %v436_v45, %v874_v2  ;;  %v440_v51 = vadd.f32 %v439_v49, %v373_v47  ;;  %v441_v52 = vpop.f32.mrb[15].mxu1 }
 0x30c   :  { %v449_v53 = vmul.f32 %v438_v48, %v874_v2  ;;  %v442_v54 = vadd.f32 %v441_v52, %v373_v47 }
 0x30d   :  { %641 = vtanh.f32 %v448_v50  ;;  %v450_v55 = vmul.f32 %v440_v51, %v874_v2 }
 0x30e   :  { %643 = vtanh.f32 %v449_v53  ;;  %v451_v56 = vmul.f32 %v442_v54, %v874_v2 }
 0x30f   :  { %v634_v57 = vpop.eup %633  ;;  %645 = vtanh.f32 %v450_v55 }
 0x310   :  { %v636_v58 = vpop.eup %635  ;;  %647 = vtanh.f32 %v451_v56 }
 0x311   :  { %v638_v59 = vpop.eup %637 }
 0x312   :  { %v640_v60 = vpop.eup %639  ;;  %v460_v24 = vpack.c.bf16 %v638_v59, %v634_v57 }
 0x313   :  { %v461_v25 = vpack.c.bf16 %v640_v60, %v636_v58 }
 0x315   :  { %472 = vmatprep.subr.bf16.mxu1 %v461_v25 }
 0x316   :  { %473 = vmatpush1.bf16.msra.mxu1 %v460_v24 }
 0x317   :  { %v642_v27 = vpop.eup %641 }
 0x318   :  { %v644_v61 = vpop.eup %643 }
 0x319   :  { %v646_v62 = vpop.eup %645 }
 0x31a   :  { %v648_v63 = vpop.eup %647  ;;  %v462_v0 = vpack.c.bf16 %v646_v62, %v642_v27 }
 0x31b   :  { %v463_v1 = vpack.c.bf16 %v648_v63, %v644_v61 }
 0x31d   :  { %474 = vmatprep.subr.bf16.mxu1 %v463_v1 }
 0x31e   :  { %475 = vmatpush1.bf16.msra.mxu1 %v462_v0 }
 0x321   :  { %553 = vmatmul.mubr.msk.bf16.vlgmr.msra.gmra.mrb[16].mxu1 %vm275_vm1, %v464_v3 }
 0x3f4   :  { %v506_v5 = vpop.f32.mrb[16].mxu1 }
 0x3f5   :  { %v508_v6 = vpop.f32.mrb[17].mxu1  ;;  %v507_v8 = vadd.f32 %v506_v5, %v467_v4 }
 0x3f6   :  { %v510_v9 = vpop.f32.mrb[18].mxu1  ;;  %v509_v10 = vadd.f32 %v508_v6, %v467_v4 }
 0x3f7   :  { %v511_v11 = vpop.f32.mrb[19].mxu1  ;;  %v513_v12 = vmul.f32 %v507_v8, %v874_v2 }
 0x3f8   :  { %v514_v13 = vmul.f32 %v509_v10, %v874_v2 }
 0x3fa   :  { %v517_v14 = vcombine.low %v513_v12, %v514_v13 }
 0x3fc   :  { %554 = vst.sshfl [vmem:[#allocation3] sm:$0x33 pattern:$0x76325410] %v517_v14 }
 0x3fd   :  { %660 = shalt.err (!%p657_p4)
}
 0x3fe   :  { %s661_s17 = scalar_lea.hbm %s950_s7, 64 }
 0x3ff   :  { %p662_p5 = scmp.ne.s32.totalorder %s950_s7, %s661_s17  ;;  %p665_p6 = scmp.lt.u32.totalorder %s661_s17, %s950_s7 }
 0x401   :  { %p667_p7 = pnand %p665_p6, %p662_p5 }
 0x403   :  { %670 = shalt.err (!%p667_p7)
}
 0x404   :  { %536 = dma.vmem_to_hbm [thread:$0]  %s534_s14, 64, %s950_s7, [#allocation4]  }
 0x405   :  { %671 = dma.done.wait [#allocation4], 64  }
 0x406   :  { %672 = vsyncadd [#allocation4], 4294967232 }
 0x407   :  { %540 = vsyncpa [#allocation4], 1 }

</bundles_post_ra>
